<compile_context>
chip_gen: v7x
topology: tpu7x:2x2x1
jax: 0.10.0
libtpu: 0.0.40
codegen_flags: <defaults>
</compile_context>

<pallas_src>
import functools

import jax
import jax.numpy as jnp
from jax import lax
from jax.experimental import pallas as pl
from jax.experimental.pallas import tpu as pltpu


def _llama_head_kernel(x_ref, watt_ref, batt_ref, wcls_ref, bcls_ref, out_ref,
                       m_sc, l_sc, acc_sc, *, num_labels, seq_len, mask_seq):
    s_idx = pl.program_id(1)

    @pl.when(s_idx == 0)
    def _init():
        m_sc[...] = jnp.full(m_sc.shape, -jnp.inf, dtype=jnp.float32)
        l_sc[...] = jnp.zeros_like(l_sc)
        acc_sc[...] = jnp.zeros_like(acc_sc)

    x = x_ref[...]                                   # (Bt, St, D), native dtype
    cdt = x.dtype                                    # bf16 stays bf16 on v6e/v7x
    w_att = watt_ref[...].astype(cdt)                # (1, D)
    b_att = batt_ref[0, 0]                           # scalar in SMEM

    # Attention scores for this sequence tile: elementwise in native dtype,
    # lane-reduce accumulated in f32.
    prod = jnp.tanh(x) * w_att                       # (Bt, St, D)
    scores = jnp.sum(prod.astype(jnp.float32), axis=-1) + b_att      # (Bt, St)

    if mask_seq:
        st = x_ref.shape[1]
        pos = s_idx * st + lax.broadcasted_iota(jnp.int32, scores.shape, 1)
        scores = jnp.where(pos < seq_len, scores, -1e30)

    # Online softmax update over the sequence axis (unnormalized accumulation).
    m_prev = m_sc[...]                                               # (Bt, 1)
    m_new = jnp.maximum(m_prev, jnp.max(scores, axis=-1, keepdims=True))
    alpha = jnp.exp(m_prev - m_new)                                  # (Bt, 1)
    e = jnp.exp(scores - m_new)                                      # (Bt, St)

    l_sc[...] = alpha * l_sc[...] + jnp.sum(e, axis=-1, keepdims=True)
    weighted = e.astype(cdt)[:, :, None] * x                         # (Bt, St, D)
    acc_sc[...] = alpha * acc_sc[...] + jnp.sum(weighted.astype(jnp.float32),
                                                axis=1)
    m_sc[...] = m_new

    @pl.when(s_idx == pl.num_programs(1) - 1)
    def _finalize():
        # Exact normalization: runs once per batch tile, so no approx recip.
        pooled = acc_sc[...] / l_sc[...]                             # (Bt, D)
        logits = jnp.dot(pooled, wcls_ref[...].astype(jnp.float32),
                         preferred_element_type=jnp.float32)
        logits = logits + bcls_ref[...].astype(jnp.float32)          # (Bt, Lp)
        # Mask padded label lanes so they do not affect the log_softmax.
        lane = lax.broadcasted_iota(jnp.int32, logits.shape, 1)
        logits = jnp.where(lane < num_labels, logits, -1e30)
        lmax = jnp.max(logits, axis=-1, keepdims=True)
        shifted = logits - lmax
        logz = jnp.log(jnp.sum(jnp.exp(shifted), axis=-1, keepdims=True))
        out_ref[...] = (shifted - logz).astype(out_ref.dtype)


def _round_up(x, m):
    return ((x + m - 1) // m) * m


def _pick_batch_tile(B, cap=16):
    """Returns (Bt, padded B). Prefers >=2 batch blocks (v7x megacore)."""
    if B <= 8:
        return B, B
    Bp = _round_up(B, 8)
    cap = max(8, (cap // 8) * 8)
    cands = [bt for bt in range(min(cap, Bp), 0, -8) if Bp % bt == 0]
    multi = [bt for bt in cands if Bp // bt >= 2]
    bt = (multi or cands)[0]
    return bt, Bp


def _pick_seq_tile(S, Bt, D, itemsize, budget_bytes):
    """Largest lane-friendly sequence tile whose streaming footprint fits."""
    # 2 double-buffered input copies + ~2 f32-wide working copies per element
    # (upcasts / the e[:,:,None]*x product) — the review's missing temporaries.
    per_st = max(1, Bt * D * (2 * itemsize + 8))
    max_st = max(8, budget_bytes // per_st)
    if S <= max_st:
        return S, S                      # whole sequence in one tile
    st = min(max_st, S)
    if st >= 128:
        st = (st // 128) * 128           # prefer lane-dense (Bt, St) score tiles
    else:
        st = (st // 8) * 8
    st = max(st, 8)
    Sp = _round_up(S, st)                # pad awkward S instead of St=S fallback
    return st, Sp


def llama_model_head(encoded_feature, w_att, b_att, w_cls, b_cls,
                     _seq_budget_override=None):
    """encoded_feature: (B, S, D); returns log-softmax logits (B, num_labels)."""
    B, S, D = encoded_feature.shape
    L = w_cls.shape[-1]
    itemsize = jnp.dtype(encoded_feature.dtype).itemsize
    Lp = _round_up(max(L, 1), 128)

    # Generation-aware VMEM budget: ~100 MiB on 128 MiB parts (v5e/v6e),
    # ~50 MiB on v7x (64 MiB physical per TC). Conservative fallback if the
    # query is unavailable.
    try:
        vmem_cap = int(pltpu.get_tpu_info().vmem_capacity_bytes)
    except Exception:
        vmem_cap = 64 * 1024 * 1024
    vmem_limit = int(min(100 * 1024 * 1024, vmem_cap * 0.78))

    Bt, Bp = _pick_batch_tile(B)

    # Fixed (non-streaming) VMEM: params/output assumed double-buffered,
    # scratch, plus compiler headroom.
    fixed = (2 * D * 4 + 2 * D * Lp * 4 + 2 * Lp * 4 + 2 * Bt * Lp * 4
             + Bt * (D + 2) * 4 + (4 << 20))
    budget = max(1 << 20, vmem_limit - fixed)
    if _seq_budget_override is not None:
        budget = int(_seq_budget_override)
    St, Sp = _pick_seq_tile(S, Bt, D, itemsize, budget)

    x = encoded_feature
    if Bp != B or Sp != S:
        x = jnp.pad(x, ((0, Bp - B), (0, Sp - S), (0, 0)))

    # Parameter plumbing: attention weight as a lane-dense (1, D) row, scalar
    # bias in SMEM, classifier weights/bias padded up to 128 label lanes.
    w_att_row = jnp.reshape(w_att, (1, D)).astype(jnp.float32)
    b_att_s = jnp.reshape(b_att, (1, 1)).astype(jnp.float32)
    w_cls_p = jnp.pad(jnp.reshape(w_cls, (D, L)).astype(jnp.float32),
                      ((0, 0), (0, Lp - L)))
    b_cls_p = jnp.pad(jnp.reshape(b_cls, (1, L)).astype(jnp.float32),
                      ((0, 0), (0, Lp - L)))

    kernel = functools.partial(_llama_head_kernel, num_labels=L, seq_len=S,
                               mask_seq=(Sp != S))

    def _call(single_buffer_params):
        def pspec(shape, index_map):
            # Grid-invariant parameters: request single buffering when supported.
            if single_buffer_params:
                return pl.BlockSpec(shape, index_map,
                                    pipeline_mode=pl.Buffered(1))
            return pl.BlockSpec(shape, index_map)

        out = pl.pallas_call(
            kernel,
            out_shape=jax.ShapeDtypeStruct((Bp, Lp), jnp.float32),
            grid=(Bp // Bt, Sp // St),
            in_specs=[
                pl.BlockSpec((Bt, St, D), lambda b, s: (b, s, 0)),      # x tile
                pspec((1, D), lambda b, s: (0, 0)),                     # w_att
                pl.BlockSpec(memory_space=pltpu.MemorySpace.SMEM),      # b_att
                pspec((D, Lp), lambda b, s: (0, 0)),                    # w_cls
                pspec((1, Lp), lambda b, s: (0, 0)),                    # b_cls
            ],
            out_specs=pl.BlockSpec((Bt, Lp), lambda b, s: (b, 0)),
            scratch_shapes=[
                pltpu.VMEM((Bt, 1), jnp.float32),   # running max m
                pltpu.VMEM((Bt, 1), jnp.float32),   # running denom l
                pltpu.VMEM((Bt, D), jnp.float32),   # unnormalized accumulator
            ],
            compiler_params=pltpu.CompilerParams(
                dimension_semantics=("parallel", "arbitrary"),
                vmem_limit_bytes=vmem_limit,
            ),
        )(x, w_att_row, b_att_s, w_cls_p, b_cls_p)
        return jax.block_until_ready(out)

    try:
        out_padded = _call(single_buffer_params=True)
    except Exception:
        # pipeline_mode=pl.Buffered(1) unsupported on this build: fall back to
        # default double-buffered parameter windows (already accounted for).
        out_padded = _call(single_buffer_params=False)

    return out_padded[:B, :L]


def reference_head(x, w_att, b_att, w_cls, b_cls):
    scores = jnp.einsum("bsd,dk->bsk", jnp.tanh(x), w_att) + b_att
    attn = jax.nn.softmax(scores, axis=1)
    pooled = jnp.sum(attn * x, axis=1)
    logits = pooled @ w_cls + b_cls
    return jax.nn.log_softmax(logits, axis=-1)


if __name__ == "__main__":
    # Small, deterministic shapes consistent with the module's forward pass.
    B, S, D, L = 2, 8, 32, 4  # batch, seq, intermediate_dims, num_labels

    key = jax.random.PRNGKey(0)
    k_x, k_wa, k_ba, k_wc, k_bc, k_lbl = jax.random.split(key, 6)

    encoded_feature = jax.random.normal(k_x, (B, S, D), dtype=jnp.float32)

    # nn.Linear(intermediate_dims, 1): stored as (D, 1), (1, 1)
    w_att = jax.random.normal(k_wa, (D, 1), dtype=jnp.float32) * 0.1
    b_att = jax.random.normal(k_ba, (1, 1), dtype=jnp.float32) * 0.1
    # nn.Linear(intermediate_dims, num_labels): stored as (D, L), (1, L)
    w_cls = jax.random.normal(k_wc, (D, L), dtype=jnp.float32) * 0.1
    b_cls = jax.random.normal(k_bc, (1, L), dtype=jnp.float32) * 0.1

    log_probs = llama_model_head(encoded_feature, w_att, b_att, w_cls, b_cls)
    log_probs = jax.block_until_ready(log_probs)

    # Optional labels path (plain-JAX glue, mirrors CrossEntropyLoss applied to
    # already-log-softmaxed logits as in the PyTorch forward).
    labels = jax.random.randint(k_lbl, (B,), 0, L)
    loss = -jnp.mean(
        jnp.take_along_axis(
            jax.nn.log_softmax(log_probs, axis=-1), labels[:, None], axis=-1
        )
    )
    loss = jax.block_until_ready(loss)

    # Correctness check against a pure-JAX reference (exact normalization now,
    # so the tolerance is tight).
    ref = reference_head(encoded_feature, w_att, b_att, w_cls, b_cls)
    assert jnp.allclose(log_probs, ref, atol=1e-4, rtol=1e-4), (
        "Pallas kernel output mismatch vs reference"
    )

    # Second check: awkward sequence length with a forced tiny streaming
    # budget, exercising the multi-tile online softmax + sequence padding /
    # masking path (St=8, S=20 padded to 24).
    S2 = 20
    x2 = jax.random.normal(jax.random.PRNGKey(1), (B, S2, D), dtype=jnp.float32)
    out2 = llama_model_head(x2, w_att, b_att, w_cls, b_cls,
                            _seq_budget_override=8 * 1024)
    out2 = jax.block_until_ready(out2)
    ref2 = reference_head(x2, w_att, b_att, w_cls, b_cls)
    assert jnp.allclose(out2, ref2, atol=1e-4, rtol=1e-4), (
        "Pallas kernel output mismatch vs reference (tiled/padded sequence)"
    )

    print("KERNEL_OK")
</pallas_src>

<mosaic_0001>
module attributes {stable_mosaic.version = 11 : i64} {
  func.func @_llama_head_kernel(%arg0: i32, %arg1: i32, %arg2: memref<2x8x32xf32, #tpu.memory_space<vmem>>, %arg3: memref<1x32xf32, #tpu.memory_space<vmem>>, %arg4: memref<1x1xf32, #tpu.memory_space<smem>>, %arg5: memref<32x128xf32, #tpu.memory_space<vmem>>, %arg6: memref<1x128xf32, #tpu.memory_space<vmem>>, %arg7: memref<2x128xf32, #tpu.memory_space<vmem>>, %arg8: memref<2x1xf32, #tpu.memory_space<vmem>>, %arg9: memref<2x1xf32, #tpu.memory_space<vmem>>, %arg10: memref<2x32xf32, #tpu.memory_space<vmem>>) attributes {dimension_semantics = [#tpu.dimension_semantics<parallel>, #tpu.dimension_semantics<arbitrary>], iteration_bounds = array<i64: 1, 1>, scalar_prefetch = 0 : i64, scratch_operands = 3 : i64, tpu.core_type = #tpu.core_type<tc>, window_params = [{transform_indices = @transform_0, window_bounds = array<i64: 2, 8, 32>}, {pipeline_mode = #tpu.pipeline_mode<synchronous>, transform_indices = @transform_1, window_bounds = array<i64: 1, 32>}, {transform_indices = @transform_2, window_bounds = array<i64: 1, 1>}, {pipeline_mode = #tpu.pipeline_mode<synchronous>, transform_indices = @transform_3, window_bounds = array<i64: 32, 128>}, {pipeline_mode = #tpu.pipeline_mode<synchronous>, transform_indices = @transform_4, window_bounds = array<i64: 1, 128>}, {transform_indices = @transform_5, window_bounds = array<i64: 2, 128>}]} {
    %c0_i32 = arith.constant 0 : i32
    %0 = arith.cmpi eq, %arg1, %c0_i32 : i32
    %1 = arith.extui %0 : i1 to i32
    %c0_i32_0 = arith.constant 0 : i32
    %2 = arith.cmpi ne, %1, %c0_i32_0 : i32
    scf.if %2 {
      %cst_24 = arith.constant 0xFF800000 : f32
      %41 = vector.broadcast %cst_24 : f32 to vector<2x1xf32>
      %c0_25 = arith.constant 0 : index
      %c0_26 = arith.constant 0 : index
      %42 = vector.load %arg8[%c0_25, %c0_26] : memref<2x1xf32, #tpu.memory_space<vmem>>, vector<2x1xf32>
      tpu.vector_store %arg8[%c0_25, %c0_26], %41 {strides = array<i32>} : memref<2x1xf32, #tpu.memory_space<vmem>>, vector<2x1xf32>,
      %cst_27 = arith.constant 0.000000e+00 : f32
      %43 = vector.broadcast %cst_27 : f32 to vector<2x1xf32>
      %c0_28 = arith.constant 0 : index
      %c0_29 = arith.constant 0 : index
      %44 = vector.load %arg9[%c0_28, %c0_29] : memref<2x1xf32, #tpu.memory_space<vmem>>, vector<2x1xf32>
      tpu.vector_store %arg9[%c0_28, %c0_29], %43 {strides = array<i32>} : memref<2x1xf32, #tpu.memory_space<vmem>>, vector<2x1xf32>,
      %cst_30 = arith.constant 0.000000e+00 : f32
      %45 = vector.broadcast %cst_30 : f32 to vector<2x32xf32>
      %c0_31 = arith.constant 0 : index
      %c0_32 = arith.constant 0 : index
      %46 = vector.load %arg10[%c0_31, %c0_32] : memref<2x32xf32, #tpu.memory_space<vmem>>, vector<2x32xf32>
      tpu.vector_store %arg10[%c0_31, %c0_32], %45 {strides = array<i32>} : memref<2x32xf32, #tpu.memory_space<vmem>>, vector<2x32xf32>,
    } else {
    }
    %c0 = arith.constant 0 : index
    %c0_1 = arith.constant 0 : index
    %c0_2 = arith.constant 0 : index
    %3 = vector.load %arg2[%c0, %c0_1, %c0_2] : memref<2x8x32xf32, #tpu.memory_space<vmem>>, vector<2x8x32xf32>
    %c0_3 = arith.constant 0 : index
    %c0_4 = arith.constant 0 : index
    %4 = vector.load %arg3[%c0_3, %c0_4] : memref<1x32xf32, #tpu.memory_space<vmem>>, vector<1x32xf32>
    %c0_5 = arith.constant 0 : index
    %c0_6 = arith.constant 0 : index
    %5 = memref.load %arg4[%c0_5, %c0_6] : memref<1x1xf32, #tpu.memory_space<smem>>
    %6 = math.tanh %3 : vector<2x8x32xf32>
    %7 = vector.shape_cast %4 : vector<1x32xf32> to vector<1x1x32xf32>
    %8 = vector.broadcast %7 : vector<1x1x32xf32> to vector<2x8x32xf32>
    %9 = arith.mulf %6, %8 : vector<2x8x32xf32>
    %cst = arith.constant dense<0.000000e+00> : vector<2x8xf32>
    %10 = vector.multi_reduction <add>, %9, %cst [2] : vector<2x8x32xf32> to vector<2x8xf32>
    %11 = vector.broadcast %5 : f32 to vector<2x8xf32>
    %12 = arith.addf %10, %11 : vector<2x8xf32>
    %c0_7 = arith.constant 0 : index
    %c0_8 = arith.constant 0 : index
    %13 = vector.load %arg8[%c0_7, %c0_8] : memref<2x1xf32, #tpu.memory_space<vmem>>, vector<2x1xf32>
    %cst_9 = arith.constant dense<0xFF800000> : vector<2xf32>
    %14 = vector.multi_reduction <maximumf>, %12, %cst_9 [1] : vector<2x8xf32> to vector<2xf32>
    %15 = vector.shape_cast %14 : vector<2xf32> to vector<2x1xf32>
    %16 = arith.maximumf %13, %15 : vector<2x1xf32>
    %17 = arith.subf %13, %16 : vector<2x1xf32>
    %18 = math.exp %17 : vector<2x1xf32>
    %19 = vector.broadcast %16 : vector<2x1xf32> to vector<2x8xf32>
    %20 = arith.subf %12, %19 : vector<2x8xf32>
    %21 = math.exp %20 : vector<2x8xf32>
    %c0_10 = arith.constant 0 : index
    %c0_11 = arith.constant 0 : index
    %22 = vector.load %arg9[%c0_10, %c0_11] : memref<2x1xf32, #tpu.memory_space<vmem>>, vector<2x1xf32>
    %23 = arith.mulf %18, %22 : vector<2x1xf32>
    %cst_12 = arith.constant dense<0.000000e+00> : vector<2xf32>
    %24 = vector.multi_reduction <add>, %21, %cst_12 [1] : vector<2x8xf32> to vector<2xf32>
    %25 = vector.shape_cast %24 : vector<2xf32> to vector<2x1xf32>
    %26 = arith.addf %23, %25 : vector<2x1xf32>
    %c0_13 = arith.constant 0 : index
    %c0_14 = arith.constant 0 : index
    %27 = vector.load %arg9[%c0_13, %c0_14] : memref<2x1xf32, #tpu.memory_space<vmem>>, vector<2x1xf32>
    tpu.vector_store %arg9[%c0_13, %c0_14], %26 {strides = array<i32>} : memref<2x1xf32, #tpu.memory_space<vmem>>, vector<2x1xf32>,
    %28 = vector.shape_cast %21 : vector<2x8xf32> to vector<2x8x1xf32>
    %29 = vector.broadcast %28 : vector<2x8x1xf32> to vector<2x8x32xf32>
    %30 = arith.mulf %29, %3 : vector<2x8x32xf32>
    %c0_15 = arith.constant 0 : index
    %c0_16 = arith.constant 0 : index
    %31 = vector.load %arg10[%c0_15, %c0_16] : memref<2x32xf32, #tpu.memory_space<vmem>>, vector<2x32xf32>
    %32 = vector.broadcast %18 : vector<2x1xf32> to vector<2x32xf32>
    %33 = arith.mulf %32, %31 : vector<2x32xf32>
    %cst_17 = arith.constant dense<0.000000e+00> : vector<2x32xf32>
    %34 = vector.multi_reduction <add>, %30, %cst_17 [1] : vector<2x8x32xf32> to vector<2x32xf32>
    %35 = arith.addf %33, %34 : vector<2x32xf32>
    %c0_18 = arith.constant 0 : index
    %c0_19 = arith.constant 0 : index
    %36 = vector.load %arg10[%c0_18, %c0_19] : memref<2x32xf32, #tpu.memory_space<vmem>>, vector<2x32xf32>
    tpu.vector_store %arg10[%c0_18, %c0_19], %35 {strides = array<i32>} : memref<2x32xf32, #tpu.memory_space<vmem>>, vector<2x32xf32>,
    %c0_20 = arith.constant 0 : index
    %c0_21 = arith.constant 0 : index
    %37 = vector.load %arg8[%c0_20, %c0_21] : memref<2x1xf32, #tpu.memory_space<vmem>>, vector<2x1xf32>
    tpu.vector_store %arg8[%c0_20, %c0_21], %16 {strides = array<i32>} : memref<2x1xf32, #tpu.memory_space<vmem>>, vector<2x1xf32>,
    %c0_i32_22 = arith.constant 0 : i32
    %38 = arith.cmpi eq, %arg1, %c0_i32_22 : i32
    %39 = arith.extui %38 : i1 to i32
    %c0_i32_23 = arith.constant 0 : i32
    %40 = arith.cmpi ne, %39, %c0_i32_23 : i32
    scf.if %40 {
      %c0_24 = arith.constant 0 : index
      %c0_25 = arith.constant 0 : index
      %41 = vector.load %arg10[%c0_24, %c0_25] : memref<2x32xf32, #tpu.memory_space<vmem>>, vector<2x32xf32>
      %c0_26 = arith.constant 0 : index
      %c0_27 = arith.constant 0 : index
      %42 = vector.load %arg9[%c0_26, %c0_27] : memref<2x1xf32, #tpu.memory_space<vmem>>, vector<2x1xf32>
      %43 = vector.broadcast %42 : vector<2x1xf32> to vector<2x32xf32>
      %44 = arith.divf %41, %43 : vector<2x32xf32>
      %c0_28 = arith.constant 0 : index
      %c0_29 = arith.constant 0 : index
      %45 = vector.load %arg5[%c0_28, %c0_29] : memref<32x128xf32, #tpu.memory_space<vmem>>, vector<32x128xf32>
      %cst_30 = arith.constant dense<0.000000e+00> : vector<2x128xf32>
      %46 = tpu.matmul %44, %45, %cst_30 {dimension_numbers = #tpu.dot_dimension_numbers<[1], [0], [0], [1], [0, 0, 1, 1], [], []>} : vector<2x32xf32>, vector<32x128xf32>, vector<2x128xf32> -> vector<2x128xf32>
      %c0_31 = arith.constant 0 : index
      %c0_32 = arith.constant 0 : index
      %47 = vector.load %arg6[%c0_31, %c0_32] : memref<1x128xf32, #tpu.memory_space<vmem>>, vector<1x128xf32>
      %48 = vector.broadcast %47 : vector<1x128xf32> to vector<2x128xf32>
      %49 = arith.addf %46, %48 : vector<2x128xf32>
      %50 = tpu.iota {dimensions = array<i32: 1>} : vector<2x128xi32>
      %c4_i32 = arith.constant 4 : i32
      %51 = vector.broadcast %c4_i32 : i32 to vector<2x128xi32>
      %52 = arith.cmpi slt, %50, %51 : vector<2x128xi32>
      %cst_33 = arith.constant -1.000000e+30 : f32
      %53 = vector.broadcast %cst_33 : f32 to vector<2x128xf32>
      %54 = arith.select %52, %49, %53 : vector<2x128xi1>, vector<2x128xf32>
      %cst_34 = arith.constant dense<0xFF800000> : vector<2xf32>
      %55 = vector.multi_reduction <maximumf>, %54, %cst_34 [1] : vector<2x128xf32> to vector<2xf32>
      %56 = vector.shape_cast %55 : vector<2xf32> to vector<2x1xf32>
      %57 = vector.broadcast %56 : vector<2x1xf32> to vector<2x128xf32>
      %58 = arith.subf %54, %57 : vector<2x128xf32>
      %59 = math.exp %58 : vector<2x128xf32>
      %cst_35 = arith.constant dense<0.000000e+00> : vector<2xf32>
      %60 = vector.multi_reduction <add>, %59, %cst_35 [1] : vector<2x128xf32> to vector<2xf32>
      %61 = vector.shape_cast %60 : vector<2xf32> to vector<2x1xf32>
      %62 = math.log %61 : vector<2x1xf32>
      %63 = vector.broadcast %62 : vector<2x1xf32> to vector<2x128xf32>
      %64 = arith.subf %58, %63 : vector<2x128xf32>
      %c0_36 = arith.constant 0 : index
      %c0_37 = arith.constant 0 : index
      %65 = vector.load %arg7[%c0_36, %c0_37] : memref<2x128xf32, #tpu.memory_space<vmem>>, vector<2x128xf32>
      tpu.vector_store %arg7[%c0_36, %c0_37], %64 {strides = array<i32>} : memref<2x128xf32, #tpu.memory_space<vmem>>, vector<2x128xf32>,
    } else {
    }
    return
  }
  func.func @transform_0(%arg0: i32, %arg1: i32) -> (i32, i32, i32) {
    %c0_i32 = arith.constant 0 : i32
    %c0_i32_0 = arith.constant 0 : i32
    return %arg0, %arg1, %c0_i32 : i32, i32, i32
  }
  func.func @transform_1(%arg0: i32, %arg1: i32) -> (i32, i32) {
    %c0_i32 = arith.constant 0 : i32
    %c0_i32_0 = arith.constant 0 : i32
    %c0_i32_1 = arith.constant 0 : i32
    return %c0_i32, %c0_i32_0 : i32, i32
  }
  func.func @transform_2(%arg0: i32, %arg1: i32) -> (i32, i32) {
    %c0_i32 = arith.constant 0 : i32
    %c0_i32_0 = arith.constant 0 : i32
    %c0_i32_1 = arith.constant 0 : i32
    return %c0_i32, %c0_i32_0 : i32, i32
  }
  func.func @transform_3(%arg0: i32, %arg1: i32) -> (i32, i32) {
    %c0_i32 = arith.constant 0 : i32
    %c0_i32_0 = arith.constant 0 : i32
    %c0_i32_1 = arith.constant 0 : i32
    return %c0_i32, %c0_i32_0 : i32, i32
  }
  func.func @transform_4(%arg0: i32, %arg1: i32) -> (i32, i32) {
    %c0_i32 = arith.constant 0 : i32
    %c0_i32_0 = arith.constant 0 : i32
    %c0_i32_1 = arith.constant 0 : i32
    return %c0_i32, %c0_i32_0 : i32, i32
  }
  func.func @transform_5(%arg0: i32, %arg1: i32) -> (i32, i32) {
    %c0_i32 = arith.constant 0 : i32
    %c0_i32_0 = arith.constant 0 : i32
    return %arg0, %c0_i32 : i32, i32
  }
}

module attributes {stable_mosaic.version = 11 : i64} {
  func.func @_llama_head_kernel(%arg0: i32, %arg1: i32, %arg2: memref<2x8x32xf32, #tpu.memory_space<vmem>>, %arg3: memref<1x32xf32, #tpu.memory_space<vmem>>, %arg4: memref<1x1xf32, #tpu.memory_space<smem>>, %arg5: memref<32x128xf32, #tpu.memory_space<vmem>>, %arg6: memref<1x128xf32, #tpu.memory_space<vmem>>, %arg7: memref<2x128xf32, #tpu.memory_space<vmem>>, %arg8: memref<2x1xf32, #tpu.memory_space<vmem>>, %arg9: memref<2x1xf32, #tpu.memory_space<vmem>>, %arg10: memref<2x32xf32, #tpu.memory_space<vmem>>) attributes {dimension_semantics = [#tpu.dimension_semantics<parallel>, #tpu.dimension_semantics<arbitrary>], iteration_bounds = array<i64: 1, 1>, scalar_prefetch = 0 : i64, scratch_operands = 3 : i64, tpu.core_type = #tpu.core_type<tc>, window_params = [{transform_indices = @transform_0, window_bounds = array<i64: 2, 8, 32>}, {pipeline_mode = #tpu.pipeline_mode<synchronous>, transform_indices = @transform_1, window_bounds = array<i64: 1, 32>}, {transform_indices = @transform_2, window_bounds = array<i64: 1, 1>}, {pipeline_mode = #tpu.pipeline_mode<synchronous>, transform_indices = @transform_3, window_bounds = array<i64: 32, 128>}, {pipeline_mode = #tpu.pipeline_mode<synchronous>, transform_indices = @transform_4, window_bounds = array<i64: 1, 128>}, {transform_indices = @transform_5, window_bounds = array<i64: 2, 128>}]} {
    %c0_i32 = arith.constant 0 : i32
    %0 = arith.cmpi eq, %arg1, %c0_i32 : i32
    %1 = arith.extui %0 : i1 to i32
    %c0_i32_0 = arith.constant 0 : i32
    %2 = arith.cmpi ne, %1, %c0_i32_0 : i32
    scf.if %2 {
      %cst_24 = arith.constant 0xFF800000 : f32
      %41 = vector.broadcast %cst_24 : f32 to vector<2x1xf32>
      %c0_25 = arith.constant 0 : index
      %c0_26 = arith.constant 0 : index
      %42 = vector.load %arg8[%c0_25, %c0_26] : memref<2x1xf32, #tpu.memory_space<vmem>>, vector<2x1xf32>
      tpu.vector_store %arg8[%c0_25, %c0_26], %41 {strides = array<i32>} : memref<2x1xf32, #tpu.memory_space<vmem>>, vector<2x1xf32>,
      %cst_27 = arith.constant 0.000000e+00 : f32
      %43 = vector.broadcast %cst_27 : f32 to vector<2x1xf32>
      %c0_28 = arith.constant 0 : index
      %c0_29 = arith.constant 0 : index
      %44 = vector.load %arg9[%c0_28, %c0_29] : memref<2x1xf32, #tpu.memory_space<vmem>>, vector<2x1xf32>
      tpu.vector_store %arg9[%c0_28, %c0_29], %43 {strides = array<i32>} : memref<2x1xf32, #tpu.memory_space<vmem>>, vector<2x1xf32>,
      %cst_30 = arith.constant 0.000000e+00 : f32
      %45 = vector.broadcast %cst_30 : f32 to vector<2x32xf32>
      %c0_31 = arith.constant 0 : index
      %c0_32 = arith.constant 0 : index
      %46 = vector.load %arg10[%c0_31, %c0_32] : memref<2x32xf32, #tpu.memory_space<vmem>>, vector<2x32xf32>
      tpu.vector_store %arg10[%c0_31, %c0_32], %45 {strides = array<i32>} : memref<2x32xf32, #tpu.memory_space<vmem>>, vector<2x32xf32>,
    } else {
    }
    %c0 = arith.constant 0 : index
    %c0_1 = arith.constant 0 : index
    %c0_2 = arith.constant 0 : index
    %3 = vector.load %arg2[%c0, %c0_1, %c0_2] : memref<2x8x32xf32, #tpu.memory_space<vmem>>, vector<2x8x32xf32>
    %c0_3 = arith.constant 0 : index
    %c0_4 = arith.constant 0 : index
    %4 = vector.load %arg3[%c0_3, %c0_4] : memref<1x32xf32, #tpu.memory_space<vmem>>, vector<1x32xf32>
    %c0_5 = arith.constant 0 : index
    %c0_6 = arith.constant 0 : index
    %5 = memref.load %arg4[%c0_5, %c0_6] : memref<1x1xf32, #tpu.memory_space<smem>>
    %6 = math.tanh %3 : vector<2x8x32xf32>
    %7 = vector.shape_cast %4 : vector<1x32xf32> to vector<1x1x32xf32>
    %8 = vector.broadcast %7 : vector<1x1x32xf32> to vector<2x8x32xf32>
    %9 = arith.mulf %6, %8 : vector<2x8x32xf32>
    %cst = arith.constant dense<0.000000e+00> : vector<2x8xf32>
    %10 = vector.multi_reduction <add>, %9, %cst [2] : vector<2x8x32xf32> to vector<2x8xf32>
    %11 = vector.broadcast %5 : f32 to vector<2x8xf32>
    %12 = arith.addf %10, %11 : vector<2x8xf32>
    %c0_7 = arith.constant 0 : index
    %c0_8 = arith.constant 0 : index
    %13 = vector.load %arg8[%c0_7, %c0_8] : memref<2x1xf32, #tpu.memory_space<vmem>>, vector<2x1xf32>
    %cst_9 = arith.constant dense<0xFF800000> : vector<2xf32>
    %14 = vector.multi_reduction <maximumf>, %12, %cst_9 [1] : vector<2x8xf32> to vector<2xf32>
    %15 = vector.shape_cast %14 : vector<2xf32> to vector<2x1xf32>
    %16 = arith.maximumf %13, %15 : vector<2x1xf32>
    %17 = arith.subf %13, %16 : vector<2x1xf32>
    %18 = math.exp %17 : vector<2x1xf32>
    %19 = vector.broadcast %16 : vector<2x1xf32> to vector<2x8xf32>
    %20 = arith.subf %12, %19 : vector<2x8xf32>
    %21 = math.exp %20 : vector<2x8xf32>
    %c0_10 = arith.constant 0 : index
    %c0_11 = arith.constant 0 : index
    %22 = vector.load %arg9[%c0_10, %c0_11] : memref<2x1xf32, #tpu.memory_space<vmem>>, vector<2x1xf32>
    %23 = arith.mulf %18, %22 : vector<2x1xf32>
    %cst_12 = arith.constant dense<0.000000e+00> : vector<2xf32>
    %24 = vector.multi_reduction <add>, %21, %cst_12 [1] : vector<2x8xf32> to vector<2xf32>
    %25 = vector.shape_cast %24 : vector<2xf32> to vector<2x1xf32>
    %26 = arith.addf %23, %25 : vector<2x1xf32>
    %c0_13 = arith.constant 0 : index
    %c0_14 = arith.constant 0 : index
    %27 = vector.load %arg9[%c0_13, %c0_14] : memref<2x1xf32, #tpu.memory_space<vmem>>, vector<2x1xf32>
    tpu.vector_store %arg9[%c0_13, %c0_14], %26 {strides = array<i32>} : memref<2x1xf32, #tpu.memory_space<vmem>>, vector<2x1xf32>,
    %28 = vector.shape_cast %21 : vector<2x8xf32> to vector<2x8x1xf32>
    %29 = vector.broadcast %28 : vector<2x8x1xf32> to vector<2x8x32xf32>
    %30 = arith.mulf %29, %3 : vector<2x8x32xf32>
    %c0_15 = arith.constant 0 : index
    %c0_16 = arith.constant 0 : index
    %31 = vector.load %arg10[%c0_15, %c0_16] : memref<2x32xf32, #tpu.memory_space<vmem>>, vector<2x32xf32>
    %32 = vector.broadcast %18 : vector<2x1xf32> to vector<2x32xf32>
    %33 = arith.mulf %32, %31 : vector<2x32xf32>
    %cst_17 = arith.constant dense<0.000000e+00> : vector<2x32xf32>
    %34 = vector.multi_reduction <add>, %30, %cst_17 [1] : vector<2x8x32xf32> to vector<2x32xf32>
    %35 = arith.addf %33, %34 : vector<2x32xf32>
    %c0_18 = arith.constant 0 : index
    %c0_19 = arith.constant 0 : index
    %36 = vector.load %arg10[%c0_18, %c0_19] : memref<2x32xf32, #tpu.memory_space<vmem>>, vector<2x32xf32>
    tpu.vector_store %arg10[%c0_18, %c0_19], %35 {strides = array<i32>} : memref<2x32xf32, #tpu.memory_space<vmem>>, vector<2x32xf32>,
    %c0_20 = arith.constant 0 : index
    %c0_21 = arith.constant 0 : index
    %37 = vector.load %arg8[%c0_20, %c0_21] : memref<2x1xf32, #tpu.memory_space<vmem>>, vector<2x1xf32>
    tpu.vector_store %arg8[%c0_20, %c0_21], %16 {strides = array<i32>} : memref<2x1xf32, #tpu.memory_space<vmem>>, vector<2x1xf32>,
    %c0_i32_22 = arith.constant 0 : i32
    %38 = arith.cmpi eq, %arg1, %c0_i32_22 : i32
    %39 = arith.extui %38 : i1 to i32
    %c0_i32_23 = arith.constant 0 : i32
    %40 = arith.cmpi ne, %39, %c0_i32_23 : i32
    scf.if %40 {
      %c0_24 = arith.constant 0 : index
      %c0_25 = arith.constant 0 : index
      %41 = vector.load %arg10[%c0_24, %c0_25] : memref<2x32xf32, #tpu.memory_space<vmem>>, vector<2x32xf32>
      %c0_26 = arith.constant 0 : index
      %c0_27 = arith.constant 0 : index
      %42 = vector.load %arg9[%c0_26, %c0_27] : memref<2x1xf32, #tpu.memory_space<vmem>>, vector<2x1xf32>
      %43 = vector.broadcast %42 : vector<2x1xf32> to vector<2x32xf32>
      %44 = arith.divf %41, %43 : vector<2x32xf32>
      %c0_28 = arith.constant 0 : index
      %c0_29 = arith.constant 0 : index
      %45 = vector.load %arg5[%c0_28, %c0_29] : memref<32x128xf32, #tpu.memory_space<vmem>>, vector<32x128xf32>
      %cst_30 = arith.constant dense<0.000000e+00> : vector<2x128xf32>
      %46 = tpu.matmul %44, %45, %cst_30 {dimension_numbers = #tpu.dot_dimension_numbers<[1], [0], [0], [1], [0, 0, 1, 1], [], []>} : vector<2x32xf32>, vector<32x128xf32>, vector<2x128xf32> -> vector<2x128xf32>
      %c0_31 = arith.constant 0 : index
      %c0_32 = arith.constant 0 : index
      %47 = vector.load %arg6[%c0_31, %c0_32] : memref<1x128xf32, #tpu.memory_space<vmem>>, vector<1x128xf32>
      %48 = vector.broadcast %47 : vector<1x128xf32> to vector<2x128xf32>
      %49 = arith.addf %46, %48 : vector<2x128xf32>
      %50 = tpu.iota {dimensions = array<i32: 1>} : vector<2x128xi32>
      %c4_i32 = arith.constant 4 : i32
      %51 = vector.broadcast %c4_i32 : i32 to vector<2x128xi32>
      %52 = arith.cmpi slt, %50, %51 : vector<2x128xi32>
      %cst_33 = arith.constant -1.000000e+30 : f32
      %53 = vector.broadcast %cst_33 : f32 to vector<2x128xf32>
      %54 = arith.select %52, %49, %53 : vector<2x128xi1>, vector<2x128xf32>
      %cst_34 = arith.constant dense<0xFF800000> : vector<2xf32>
      %55 = vector.multi_reduction <maximumf>, %54, %cst_34 [1] : vector<2x128xf32> to vector<2xf32>
      %56 = vector.shape_cast %55 : vector<2xf32> to vector<2x1xf32>
      %57 = vector.broadcast %56 : vector<2x1xf32> to vector<2x128xf32>
      %58 = arith.subf %54, %57 : vector<2x128xf32>
      %59 = math.exp %58 : vector<2x128xf32>
      %cst_35 = arith.constant dense<0.000000e+00> : vector<2xf32>
      %60 = vector.multi_reduction <add>, %59, %cst_35 [1] : vector<2x128xf32> to vector<2xf32>
      %61 = vector.shape_cast %60 : vector<2xf32> to vector<2x1xf32>
      %62 = math.log %61 : vector<2x1xf32>
      %63 = vector.broadcast %62 : vector<2x1xf32> to vector<2x128xf32>
      %64 = arith.subf %58, %63 : vector<2x128xf32>
      %c0_36 = arith.constant 0 : index
      %c0_37 = arith.constant 0 : index
      %65 = vector.load %arg7[%c0_36, %c0_37] : memref<2x128xf32, #tpu.memory_space<vmem>>, vector<2x128xf32>
      tpu.vector_store %arg7[%c0_36, %c0_37], %64 {strides = array<i32>} : memref<2x128xf32, #tpu.memory_space<vmem>>, vector<2x128xf32>,
    } else {
    }
    return
  }
  func.func @transform_0(%arg0: i32, %arg1: i32) -> (i32, i32, i32) {
    %c0_i32 = arith.constant 0 : i32
    %c0_i32_0 = arith.constant 0 : i32
    return %arg0, %arg1, %c0_i32 : i32, i32, i32
  }
  func.func @transform_1(%arg0: i32, %arg1: i32) -> (i32, i32) {
    %c0_i32 = arith.constant 0 : i32
    %c0_i32_0 = arith.constant 0 : i32
    %c0_i32_1 = arith.constant 0 : i32
    return %c0_i32, %c0_i32_0 : i32, i32
  }
  func.func @transform_2(%arg0: i32, %arg1: i32) -> (i32, i32) {
    %c0_i32 = arith.constant 0 : i32
    %c0_i32_0 = arith.constant 0 : i32
    %c0_i32_1 = arith.constant 0 : i32
    return %c0_i32, %c0_i32_0 : i32, i32
  }
  func.func @transform_3(%arg0: i32, %arg1: i32) -> (i32, i32) {
    %c0_i32 = arith.constant 0 : i32
    %c0_i32_0 = arith.constant 0 : i32
    %c0_i32_1 = arith.constant 0 : i32
    return %c0_i32, %c0_i32_0 : i32, i32
  }
  func.func @transform_4(%arg0: i32, %arg1: i32) -> (i32, i32) {
    %c0_i32 = arith.constant 0 : i32
    %c0_i32_0 = arith.constant 0 : i32
    %c0_i32_1 = arith.constant 0 : i32
    return %c0_i32, %c0_i32_0 : i32, i32
  }
  func.func @transform_5(%arg0: i32, %arg1: i32) -> (i32, i32) {
    %c0_i32 = arith.constant 0 : i32
    %c0_i32_0 = arith.constant 0 : i32
    return %arg0, %c0_i32 : i32, i32
  }
}

</mosaic_0001>

<bundles_post_ra>
// kernel: tpu_custom_call.1
= control target key start
LH: loop header
LB: loop body
LE: loop exit
PB: predicated region body
PF: predicated region fallthrough
CT: control target
= control target key end

     0   :  { %11 = vsyncpa [#allocation7], 0  ;;  %s555_s0 = inlined_call_operand.hbm [shape: f32[2,8,32], index: 0, kind: input, shape index: {}]   ;;  %s556_s1 = inlined_call_operand.vmem [shape: f32[1,32], index: 1, kind: input, shape index: {}]   ;;  %s557_s2 = inlined_call_operand.<no memory space> [shape: f32[1,1], index: 2, kind: input, shape index: {}]   ;;  %s558_s3 = inlined_call_operand.hbm [shape: f32[32,128], index: 3, kind: input, shape index: {}]   ;;  %s559_s4 = inlined_call_operand.vmem [shape: f32[1,128], index: 4, kind: input, shape index: {}]   ;;  %s560_s5 = inlined_call_operand.hbm [shape: f32[2,128], index: 5, kind: output, shape index: {}]  }
   0x1   :  { %12 = vsyncpa [#allocation10], 0 }
   0x2   :  { %13 = vsyncpa [#allocation8], 0  ;;  %s439_s18 = smov [#allocation6]   ;;  %s367_s22 = scalar_lea.hbm %s555_s0, 256 }
   0x3   :  { %s19_s19 = sshll.u32 %s439_s18, 4  ;;  %p368_p0 = scmp.ne.s32.totalorder %s555_s0, %s367_s22  ;;  %s20_s19 = int_to_ptr.vmem [resolvable:$true] %s19_s19 }
   0x4   :  { %p371_p1 = scmp.lt.u32.totalorder %s367_s22, %s555_s0 }
   0x6   :  { %p373_p2 = pnand %p371_p1, %p368_p0 }
   0x8   :  { %376 = shalt.err (!%p373_p2)
}
   0x9   :  { %s377_s27 = scalar_lea.vmem %s20_s19, 256  ;;  %p382_p4 = scmp.lt.s32.totalorder %s20_s19, %s20_s19 }
   0xa   :  { %p378_p3 = scmp.ne.s32.totalorder %s20_s19, %s377_s27  ;;  %p383_p5 = scmp.lt.s32.totalorder %s377_s27, %s377_s27 }
   0xc   :  { %p384_p6 = por %p383_p5, %p382_p4 }
   0xe   :  { %p385_p7 = pnand %p384_p6, %p378_p3 }
  0x10   :  { %388 = shalt.err (!%p385_p7)
}
  0x11   :  { %s440_s28 = smov 128   ;;  %s441_s29 = smov 8  }
  0x12   :  { %25 = dma.hbm_to_vmem [thread:$0]  %s555_s0, 256, %s20_s19, [#allocation7], %s440_s28, %s440_s28, %s441_s29  }
  0x13   :  { %s442_s7 = smov [#allocation9]   ;;  %s389_s11 = scalar_lea.hbm %s558_s3, 512 }
  0x14   :  { %s35_s8 = sshll.u32 %s442_s7, 4  ;;  %p390_p8 = scmp.ne.s32.totalorder %s558_s3, %s389_s11  ;;  %s36_s8 = int_to_ptr.vmem [resolvable:$true] %s35_s8 }
  0x15   :  { %p393_p9 = scmp.lt.u32.totalorder %s389_s11, %s558_s3 }
  0x17   :  { %p395_p10 = pnand %p393_p9, %p390_p8 }
  0x19   :  { %398 = shalt.err (!%p395_p10)
}
  0x1a   :  { %s399_s16 = scalar_lea.vmem %s36_s8, 512  ;;  %p404_p12 = scmp.lt.s32.totalorder %s36_s8, %s36_s8 }
  0x1b   :  { %p400_p11 = scmp.ne.s32.totalorder %s36_s8, %s399_s16  ;;  %p405_p13 = scmp.lt.s32.totalorder %s399_s16, %s399_s16 }
  0x1d   :  { %p406_p0 = por %p405_p13, %p404_p12 }
  0x1f   :  { %p407_p1 = pnand %p406_p0, %p400_p11 }
  0x21   :  { %410 = shalt.err (!%p407_p1)
}
  0x22   :  { %41 = dma.hbm_to_vmem [thread:$0]  %s558_s3, 512, %s36_s8, [#allocation10], %s440_s28, %s440_s28, %s441_s29  }
  0x23   :  { %433 = dma.done.wait [#allocation7], 256  }
  0x24   :  { %434 = vsyncadd [#allocation7], 4294967040 }
  0x25   :  { %435 = dma.done.wait [#allocation10], 512  }
  0x26   :  { %436 = vsyncadd [#allocation10], 4294966784  ;;  %v503_v0 = vld [vmem:[#allocation6] sm:$0xff]  ;;  %v505_v1 = vld [vmem:[#allocation6 + $0x8] sm:$0xff]  ;;  %vm73_vm0 = vcmask 261120   ;;  %vm54_vm1 = vcmask 1024   ;;  %v86_v10 = vlaneseq  ;;  %v80_v13 = vstv %s557_s2 }
  0x27   :  { %351 = vtanh.f32 %v503_v0  ;;  %v314_v2 = vld [vmem:[%s556_s1] ss:$0 sm:$0xff]  ;;  %v443_v9 = vmov -inf   ;;  %vm96_vm2 = vcmask 1041409   ;;  %vm99_vm3 = vcmask 58368  }
  0x28   :  { %353 = vtanh.f32 %v505_v1  ;;  %55 = vst.msk [vmem:[#allocation2] sm:$0x3] %vm54_vm1, %v443_v9  ;;  %v515_v11 = vand.u32 127, %v86_v10  ;;  %v89_v12 = vshrl.u32 %v86_v10, 7  ;;  %v444_v23 = vmov 0   ;;  %v198_v10 = vld [vmem:[#allocation9] sm:$0xff] }
  0x29   :  { %349 = vset.pattern.permute.xlu1 %v444_v23  ;;  %350 = vset.pattern.permute.xlu0 %v444_v23  ;;  %v445_v24 = vmov 0.0   ;;  %vm57_vm4 = vcmask 254976   ;;  %vm447_vm5 = vmmov 0   ;;  %vm284_vm7 = vcmask 1041408  }
  0x2a   :  { %v90_v15 = vsub.s32 %v515_v11, %v89_v12  ;;  %56 = vst.msk [vmem:[#allocation3] sm:$0x3] %vm54_vm1, %v445_v24  ;;  %v113_v29 = vsub.s32 0, %v89_v12  ;;  %v117_v30 = vsub.s32 1, %v89_v12  ;;  %v199_v12 = vld [vmem:[#allocation9 + $0x8] sm:$0xff]  ;;  %330 = vmatprep.mubr.msk.f32.mxu0 %vm447_vm5, %v445_v24  ;;  %vm282_vm6 = vcmp.lt.s32.totalorder %v515_v11, 4 }
  0x2b   :  { %58 = vst.msk [vmem:[#allocation4] sm:$0x3] %vm57_vm4, %v445_v24 }
  0x2f   :  { %v83_v25 = vld [vmem:[#allocation2] sm:$0x3] }
  0x31   :  { %v352_v3 = vpop.eup %351 }
  0x32   :  { %v354_v4 = vpop.eup %353  ;;  %v71_v5 = vmul.f32 %v352_v3, %v314_v2  ;;  %v157_v62 = vld [vmem:[#allocation4] sm:$0x3] }
  0x33   :  { %v72_v6 = vmul.f32 %v354_v4, %v314_v2 }
  0x34   :  { %v74_v7 = vsel %vm73_vm0, %v71_v5, 0.0  ;;  %v127_v5 = vld [vmem:[#allocation3] sm:$0x3] }
  0x35   :  { %75 = vadd.xlane.f32.xlu0 %v74_v7  ;;  %v77_v8 = vsel %vm73_vm0, %v72_v6, 0.0 }
  0x39   :  { %78 = vadd.xlane.f32.xlu0 %v77_v8 }
  0xc2   :  { %v76_v14 = vpop.xlane.xlu0 %75 }
  0xc3   :  { %v81_v16 = vadd.f32 %v80_v13, %v76_v14  ;;  %v446_v14 = vmov 0.0|0.0  }
  0xc4   :  { %333 = vmatprep.subr.bf16.mxu0 %v446_v14 }
  0xc5   :  { %v91_v19 = vrot.slane %v81_v16, %v90_v15 }
  0xc6   :  { %v79_v17 = vpop.xlane.xlu0 %78 }
  0xc7   :  { %v82_v18 = vadd.f32 %v80_v13, %v79_v17  ;;  %v200_v13 = vld [vmem:[#allocation9 + $0x10] sm:$0xff] }
  0xc9   :  { %v95_v20 = vrot.slane %v82_v18, %v90_v15 }
  0xcb   :  { %v97_v21 = vsel %vm96_vm2, %v95_v20, %v91_v19 }
  0xcc   :  { %v100_v22 = vsel %vm99_vm3, %v97_v21, -inf }
  0xcd   :  { %101 = vmax.xlane.f32.xlu1 %v100_v22  ;;  %v315_v22 = vld [vmem:[%s559_s4] ss:$0 sm:$0xff]  ;;  %s448_s4 = smov [#allocation11]  }
  0xce   :  { %s304_s21 = sshll.u32 %s448_s4, 4  ;;  %s305_s21 = int_to_ptr.vmem [resolvable:$true] %s304_s21 }
  0xcf   :  { %s411_s22 = scalar_lea.vmem %s305_s21, 32  ;;  %p416_p3 = scmp.lt.s32.totalorder %s305_s21, %s305_s21 }
  0xd0   :  { %p412_p2 = scmp.ne.s32.totalorder %s305_s21, %s411_s22  ;;  %p417_p4 = scmp.lt.s32.totalorder %s411_s22, %s411_s22 }
  0xd2   :  { %p418_p5 = por %p417_p4, %p416_p3 }
  0xd4   :  { %p419_p6 = pnand %p418_p5, %p412_p2 }
 0x15a   :  { %v102_v26 = vpop.xlane.xlu1 %101 }
 0x15b   :  { %v103_v27 = vmax.f32 %v83_v25, %v102_v26 }
 0x15d   :  { %v104_v28 = vsub.f32 %v83_v25, %v103_v27  ;;  %185 = vst.msk [vmem:[#allocation2] sm:$0x3] %vm54_vm1, %v103_v27  ;;  %109 = vperm.xlu1 %349, %v103_v27  }
 0x15f   :  { %v105_v38 = vmul.f32 1.442695, %v104_v28 }
 0x1dc   :  { %v110_v31 = vpop.permute.xlu1 %109 }
 0x1dd   :  { %v114_v32 = vrot.slane %v110_v31, %v113_v29  ;;  %v118_v33 = vrot.slane %v110_v31, %v117_v30 }
 0x1df   :  { %v121_v34 = vsub.f32 %v81_v16, %v114_v32  ;;  %v122_v35 = vsub.f32 %v82_v18, %v118_v33  ;;  %v201_v16 = vld [vmem:[#allocation9 + $0x18] sm:$0xff] }
 0x1e0   :  { %v337_v17 = vpack.c.bf16 %v201_v16, %v200_v13 }
 0x1e1   :  { %v123_v36 = vmul.f32 1.442695, %v121_v34  ;;  %v125_v37 = vmul.f32 1.442695, %v122_v35 }
 0x1e3   :  { %355 = vpow2.f32 %v123_v36 }
 0x1e4   :  { %357 = vpow2.f32 %v125_v37 }
 0x1e5   :  { %359 = vpow2.f32 %v105_v38 }
 0x1ed   :  { %v356_v39 = vpop.eup %355 }
 0x1ee   :  { %v358_v40 = vpop.eup %357  ;;  %132 = vperm.xlu0 %350, %v356_v39  }
 0x1ef   :  { %135 = vperm.xlu1 %349, %v358_v40   ;;  %v360_v41 = vpop.eup %359 }
 0x1f0   :  { %v128_v6 = vmul.f32 %v360_v41, %v127_v5 }
 0x1f2   :  { %160 = vperm.xlu0 %350, %v360_v41  }
 0x26d   :  { %v133_v42 = vpop.permute.xlu0 %132 }
 0x26e   :  { %v136_v43 = vpop.permute.xlu1 %135  ;;  %v140_v44 = vrot.slane %v133_v42, %v90_v15  ;;  %v155_v45 = vmul.f32 %v133_v42, %v503_v0 }
 0x26f   :  { %v144_v46 = vrot.slane %v136_v43, %v90_v15  ;;  %v156_v47 = vmul.f32 %v136_v43, %v505_v1  ;;  %v334_v15 = vpack.c.bf16 %v199_v12, %v198_v10 }
 0x270   :  { %v164_v48 = vsel %vm73_vm0, %v155_v45, 0.0 }
 0x271   :  { %v171_v49 = vsel %vm73_vm0, %v156_v47, 0.0  ;;  %v165_v50 = vrot.slane %v164_v48, 4  ;;  %v145_v51 = vsel %vm96_vm2, %v144_v46, %v140_v44  ;;  %v161_v63 = vpop.permute.xlu0 %160  ;;  %335 = vmatpush3.bf16.msra.mxu0 %v334_v15 }
 0x272   :  { %v172_v52 = vrot.slane %v171_v49, 4  ;;  %v147_v53 = vsel %vm99_vm3, %v145_v51, 0.0  ;;  %v163_v2 = vmul.f32 %v161_v63, %v157_v62  ;;  %336 = vmatprep.subr.bf16.mxu0 %v446_v14 }
 0x273   :  { %v166_v54 = vadd.f32 %v165_v50, %v164_v48  ;;  %148 = vadd.xlane.f32.xlu1 %v147_v53 }
 0x274   :  { %v173_v55 = vadd.f32 %v172_v52, %v171_v49 }
 0x275   :  { %v167_v56 = vrot.slane %v166_v54, 2  ;;  %338 = vmatpush3.bf16.msra.mxu0 %v337_v17 }
 0x276   :  { %v174_v57 = vrot.slane %v173_v55, 2 }
 0x277   :  { %v168_v58 = vadd.f32 %v167_v56, %v166_v54 }
 0x278   :  { %v175_v59 = vadd.f32 %v174_v57, %v173_v55 }
 0x279   :  { %v169_v60 = vrot.slane %v168_v58, 1 }
 0x27a   :  { %v176_v61 = vrot.slane %v175_v59, 1 }
 0x27b   :  { %v170_v0 = vadd.f32 %v169_v60, %v168_v58 }
 0x27c   :  { %v177_v1 = vadd.f32 %v176_v61, %v175_v59 }
 0x27e   :  { %v180_v3 = vsel %vm96_vm2, %v177_v1, %v170_v0 }
 0x27f   :  { %v182_v4 = vadd.f32 %v180_v3, %v163_v2 }
 0x281   :  { %184 = vst.msk [vmem:[#allocation4] sm:$0x3] %vm57_vm4, %v182_v4 }
 0x288   :  { %v189_v20 = vld [vmem:[#allocation4] sm:$0x3] }
 0x300   :  { %v149_v7 = vpop.xlane.xlu1 %148 }
 0x301   :  { %v150_v8 = vadd.f32 %v149_v7, %v128_v6 }
 0x303   :  { %152 = vst.msk [vmem:[#allocation3] sm:$0x3] %vm54_vm1, %v150_v8 }
 0x30a   :  { %v190_v9 = vld [vmem:[#allocation3] sm:$0x3] }
 0x30b   :  { %193 = vperm.xlu0 %350, %v190_v9  }
 0x38a   :  { %v194_v18 = vpop.permute.xlu0 %193 }
 0x38b   :  { %361 = vrcp.f32 %v194_v18 }
 0x395   :  { %v362_v19 = vpop.eup %361 }
 0x396   :  { %v197_v21 = vmul.f32 %v362_v19, %v189_v20 }
 0x398   :  { %331 = vmatmul.mubr.msk.f32.vlgmr.msra.gmra.mrb[0].mxu0 %vm73_vm0, %v197_v21 }
 0x46b   :  { %v278_v23 = vpop.f32.mrb[0].mxu0 }
 0x46c   :  { %v279_v25 = vadd.f32 %v315_v22, %v278_v23  ;;  %v332_v24 = vpop.f32.mrb[1].mxu0 }
 0x46e   :  { %v283_v26 = vsel %vm282_vm6, %v279_v25, -1e+30 }
 0x46f   :  { %v285_v27 = vsel %vm284_vm7, %v283_v26, -inf }
 0x470   :  { %286 = vmax.xlane.f32.xlu0 %v285_v27 }
 0x4fd   :  { %v287_v28 = vpop.xlane.xlu0 %286 }
 0x4fe   :  { %v288_v29 = vsub.f32 %v283_v26, %v287_v28 }
 0x500   :  { %v289_v30 = vmul.f32 1.442695, %v288_v29 }
 0x502   :  { %363 = vpow2.f32 %v289_v30 }
 0x50c   :  { %v364_v31 = vpop.eup %363 }
 0x50d   :  { %v291_v32 = vsel %vm284_vm7, %v364_v31, 0.0 }
 0x50e   :  { %292 = vadd.xlane.f32.xlu1 %v291_v32 }
 0x59b   :  { %v293_v33 = vpop.xlane.xlu1 %292 }
 0x59c   :  { %365 = vlog2.f32 %v293_v33 }
 0x5a6   :  { %v366_v34 = vpop.eup %365 }
 0x5a7   :  { %v295_v35 = vmul.f32 0.6931472, %v366_v34 }
 0x5a9   :  { %v296_v11 = vsub.f32 %v288_v29, %v295_v35 }
 0x5ab   :  { %297 = vst [vmem:[#allocation11] sm:$0x3] %v296_v11 }
 0x5ac   :  { %422 = shalt.err (!%p419_p6)
}
 0x5ad   :  { %s423_s25 = scalar_lea.hbm %s560_s5, 32 }
 0x5ae   :  { %p424_p7 = scmp.ne.s32.totalorder %s560_s5, %s423_s25  ;;  %p427_p8 = scmp.lt.u32.totalorder %s423_s25, %s560_s5 }
 0x5b0   :  { %p429_p9 = pnand %p427_p8, %p424_p7 }
 0x5b2   :  { %432 = shalt.err (!%p429_p9)
}
 0x5b3   :  { %307 = dma.vmem_to_hbm [thread:$0]  %s305_s21, 32, %s560_s5, [#allocation8]  }
 0x5b4   :  { %437 = dma.done.wait [#allocation8], 32  }
 0x5b5   :  { %438 = vsyncadd [#allocation8], 4294967264 }
 0x5b6   :  { %311 = vsyncpa [#allocation7], 1 }
 0x5b7   :  { %312 = vsyncpa [#allocation10], 1 }
 0x5b8   :  { %313 = vsyncpa [#allocation8], 1 }

// kernel: tpu_custom_call.1
= control target key start
LH: loop header
LB: loop body
LE: loop exit
PB: predicated region body
PF: predicated region fallthrough
CT: control target
= control target key end

     0   :  { %11 = vsyncpa [#allocation7], 0  ;;  %s555_s0 = inlined_call_operand.hbm [shape: f32[2,8,32], index: 0, kind: input, shape index: {}]   ;;  %s556_s1 = inlined_call_operand.vmem [shape: f32[1,32], index: 1, kind: input, shape index: {}]   ;;  %s557_s2 = inlined_call_operand.<no memory space> [shape: f32[1,1], index: 2, kind: input, shape index: {}]   ;;  %s558_s3 = inlined_call_operand.hbm [shape: f32[32,128], index: 3, kind: input, shape index: {}]   ;;  %s559_s4 = inlined_call_operand.vmem [shape: f32[1,128], index: 4, kind: input, shape index: {}]   ;;  %s560_s5 = inlined_call_operand.hbm [shape: f32[2,128], index: 5, kind: output, shape index: {}]  }
   0x1   :  { %12 = vsyncpa [#allocation10], 0 }
   0x2   :  { %13 = vsyncpa [#allocation8], 0  ;;  %s439_s18 = smov [#allocation6]   ;;  %s367_s22 = scalar_lea.hbm %s555_s0, 256 }
   0x3   :  { %s19_s19 = sshll.u32 %s439_s18, 4  ;;  %p368_p0 = scmp.ne.s32.totalorder %s555_s0, %s367_s22  ;;  %s20_s19 = int_to_ptr.vmem [resolvable:$true] %s19_s19 }
   0x4   :  { %p371_p1 = scmp.lt.u32.totalorder %s367_s22, %s555_s0 }
   0x6   :  { %p373_p2 = pnand %p371_p1, %p368_p0 }
   0x8   :  { %376 = shalt.err (!%p373_p2)
}
   0x9   :  { %s377_s27 = scalar_lea.vmem %s20_s19, 256  ;;  %p382_p4 = scmp.lt.s32.totalorder %s20_s19, %s20_s19 }
   0xa   :  { %p378_p3 = scmp.ne.s32.totalorder %s20_s19, %s377_s27  ;;  %p383_p5 = scmp.lt.s32.totalorder %s377_s27, %s377_s27 }
   0xc   :  { %p384_p6 = por %p383_p5, %p382_p4 }
   0xe   :  { %p385_p7 = pnand %p384_p6, %p378_p3 }
  0x10   :  { %388 = shalt.err (!%p385_p7)
}
  0x11   :  { %s440_s28 = smov 128   ;;  %s441_s29 = smov 8  }
  0x12   :  { %25 = dma.hbm_to_vmem [thread:$0]  %s555_s0, 256, %s20_s19, [#allocation7], %s440_s28, %s440_s28, %s441_s29  }
  0x13   :  { %s442_s7 = smov [#allocation9]   ;;  %s389_s11 = scalar_lea.hbm %s558_s3, 512 }
  0x14   :  { %s35_s8 = sshll.u32 %s442_s7, 4  ;;  %p390_p8 = scmp.ne.s32.totalorder %s558_s3, %s389_s11  ;;  %s36_s8 = int_to_ptr.vmem [resolvable:$true] %s35_s8 }
  0x15   :  { %p393_p9 = scmp.lt.u32.totalorder %s389_s11, %s558_s3 }
  0x17   :  { %p395_p10 = pnand %p393_p9, %p390_p8 }
  0x19   :  { %398 = shalt.err (!%p395_p10)
}
  0x1a   :  { %s399_s16 = scalar_lea.vmem %s36_s8, 512  ;;  %p404_p12 = scmp.lt.s32.totalorder %s36_s8, %s36_s8 }
  0x1b   :  { %p400_p11 = scmp.ne.s32.totalorder %s36_s8, %s399_s16  ;;  %p405_p13 = scmp.lt.s32.totalorder %s399_s16, %s399_s16 }
  0x1d   :  { %p406_p0 = por %p405_p13, %p404_p12 }
  0x1f   :  { %p407_p1 = pnand %p406_p0, %p400_p11 }
  0x21   :  { %410 = shalt.err (!%p407_p1)
}
  0x22   :  { %41 = dma.hbm_to_vmem [thread:$0]  %s558_s3, 512, %s36_s8, [#allocation10], %s440_s28, %s440_s28, %s441_s29  }
  0x23   :  { %433 = dma.done.wait [#allocation7], 256  }
  0x24   :  { %434 = vsyncadd [#allocation7], 4294967040 }
  0x25   :  { %435 = dma.done.wait [#allocation10], 512  }
  0x26   :  { %436 = vsyncadd [#allocation10], 4294966784  ;;  %v503_v0 = vld [vmem:[#allocation6] sm:$0xff]  ;;  %v505_v1 = vld [vmem:[#allocation6 + $0x8] sm:$0xff]  ;;  %vm73_vm0 = vcmask 261120   ;;  %vm54_vm1 = vcmask 1024   ;;  %v86_v10 = vlaneseq  ;;  %v80_v13 = vstv %s557_s2 }
  0x27   :  { %351 = vtanh.f32 %v503_v0  ;;  %v314_v2 = vld [vmem:[%s556_s1] ss:$0 sm:$0xff]  ;;  %v443_v9 = vmov -inf   ;;  %vm96_vm2 = vcmask 1041409   ;;  %vm99_vm3 = vcmask 58368  }
  0x28   :  { %353 = vtanh.f32 %v505_v1  ;;  %55 = vst.msk [vmem:[#allocation2] sm:$0x3] %vm54_vm1, %v443_v9  ;;  %v515_v11 = vand.u32 127, %v86_v10  ;;  %v89_v12 = vshrl.u32 %v86_v10, 7  ;;  %v444_v23 = vmov 0   ;;  %v198_v10 = vld [vmem:[#allocation9] sm:$0xff] }
  0x29   :  { %349 = vset.pattern.permute.xlu1 %v444_v23  ;;  %350 = vset.pattern.permute.xlu0 %v444_v23  ;;  %v445_v24 = vmov 0.0   ;;  %vm57_vm4 = vcmask 254976   ;;  %vm447_vm5 = vmmov 0   ;;  %vm284_vm7 = vcmask 1041408  }
  0x2a   :  { %v90_v15 = vsub.s32 %v515_v11, %v89_v12  ;;  %56 = vst.msk [vmem:[#allocation3] sm:$0x3] %vm54_vm1, %v445_v24  ;;  %v113_v29 = vsub.s32 0, %v89_v12  ;;  %v117_v30 = vsub.s32 1, %v89_v12  ;;  %v199_v12 = vld [vmem:[#allocation9 + $0x8] sm:$0xff]  ;;  %330 = vmatprep.mubr.msk.f32.mxu0 %vm447_vm5, %v445_v24  ;;  %vm282_vm6 = vcmp.lt.s32.totalorder %v515_v11, 4 }
  0x2b   :  { %58 = vst.msk [vmem:[#allocation4] sm:$0x3] %vm57_vm4, %v445_v24 }
  0x2f   :  { %v83_v25 = vld [vmem:[#allocation2] sm:$0x3] }
  0x31   :  { %v352_v3 = vpop.eup %351 }
  0x32   :  { %v354_v4 = vpop.eup %353  ;;  %v71_v5 = vmul.f32 %v352_v3, %v314_v2  ;;  %v157_v62 = vld [vmem:[#allocation4] sm:$0x3] }
  0x33   :  { %v72_v6 = vmul.f32 %v354_v4, %v314_v2 }
  0x34   :  { %v74_v7 = vsel %vm73_vm0, %v71_v5, 0.0  ;;  %v127_v5 = vld [vmem:[#allocation3] sm:$0x3] }
  0x35   :  { %75 = vadd.xlane.f32.xlu0 %v74_v7  ;;  %v77_v8 = vsel %vm73_vm0, %v72_v6, 0.0 }
  0x39   :  { %78 = vadd.xlane.f32.xlu0 %v77_v8 }
  0xc2   :  { %v76_v14 = vpop.xlane.xlu0 %75 }
  0xc3   :  { %v81_v16 = vadd.f32 %v80_v13, %v76_v14  ;;  %v446_v14 = vmov 0.0|0.0  }
  0xc4   :  { %333 = vmatprep.subr.bf16.mxu0 %v446_v14 }
  0xc5   :  { %v91_v19 = vrot.slane %v81_v16, %v90_v15 }
  0xc6   :  { %v79_v17 = vpop.xlane.xlu0 %78 }
  0xc7   :  { %v82_v18 = vadd.f32 %v80_v13, %v79_v17  ;;  %v200_v13 = vld [vmem:[#allocation9 + $0x10] sm:$0xff] }
  0xc9   :  { %v95_v20 = vrot.slane %v82_v18, %v90_v15 }
  0xcb   :  { %v97_v21 = vsel %vm96_vm2, %v95_v20, %v91_v19 }
  0xcc   :  { %v100_v22 = vsel %vm99_vm3, %v97_v21, -inf }
  0xcd   :  { %101 = vmax.xlane.f32.xlu1 %v100_v22  ;;  %v315_v22 = vld [vmem:[%s559_s4] ss:$0 sm:$0xff]  ;;  %s448_s4 = smov [#allocation11]  }
  0xce   :  { %s304_s21 = sshll.u32 %s448_s4, 4  ;;  %s305_s21 = int_to_ptr.vmem [resolvable:$true] %s304_s21 }
  0xcf   :  { %s411_s22 = scalar_lea.vmem %s305_s21, 32  ;;  %p416_p3 = scmp.lt.s32.totalorder %s305_s21, %s305_s21 }
  0xd0   :  { %p412_p2 = scmp.ne.s32.totalorder %s305_s21, %s411_s22  ;;  %p417_p4 = scmp.lt.s32.totalorder %s411_s22, %s411_s22 }
  0xd2   :  { %p418_p5 = por %p417_p4, %p416_p3 }
  0xd4   :  { %p419_p6 = pnand %p418_p5, %p412_p2 }
 0x15a   :  { %v102_v26 = vpop.xlane.xlu1 %101 }
 0x15b   :  { %v103_v27 = vmax.f32 %v83_v25, %v102_v26 }
 0x15d   :  { %v104_v28 = vsub.f32 %v83_v25, %v103_v27  ;;  %185 = vst.msk [vmem:[#allocation2] sm:$0x3] %vm54_vm1, %v103_v27  ;;  %109 = vperm.xlu1 %349, %v103_v27  }
 0x15f   :  { %v105_v38 = vmul.f32 1.442695, %v104_v28 }
 0x1dc   :  { %v110_v31 = vpop.permute.xlu1 %109 }
 0x1dd   :  { %v114_v32 = vrot.slane %v110_v31, %v113_v29  ;;  %v118_v33 = vrot.slane %v110_v31, %v117_v30 }
 0x1df   :  { %v121_v34 = vsub.f32 %v81_v16, %v114_v32  ;;  %v122_v35 = vsub.f32 %v82_v18, %v118_v33  ;;  %v201_v16 = vld [vmem:[#allocation9 + $0x18] sm:$0xff] }
 0x1e0   :  { %v337_v17 = vpack.c.bf16 %v201_v16, %v200_v13 }
 0x1e1   :  { %v123_v36 = vmul.f32 1.442695, %v121_v34  ;;  %v125_v37 = vmul.f32 1.442695, %v122_v35 }
 0x1e3   :  { %355 = vpow2.f32 %v123_v36 }
 0x1e4   :  { %357 = vpow2.f32 %v125_v37 }
 0x1e5   :  { %359 = vpow2.f32 %v105_v38 }
 0x1ed   :  { %v356_v39 = vpop.eup %355 }
 0x1ee   :  { %v358_v40 = vpop.eup %357  ;;  %132 = vperm.xlu0 %350, %v356_v39  }
 0x1ef   :  { %135 = vperm.xlu1 %349, %v358_v40   ;;  %v360_v41 = vpop.eup %359 }
 0x1f0   :  { %v128_v6 = vmul.f32 %v360_v41, %v127_v5 }
 0x1f2   :  { %160 = vperm.xlu0 %350, %v360_v41  }
 0x26d   :  { %v133_v42 = vpop.permute.xlu0 %132 }
 0x26e   :  { %v136_v43 = vpop.permute.xlu1 %135  ;;  %v140_v44 = vrot.slane %v133_v42, %v90_v15  ;;  %v155_v45 = vmul.f32 %v133_v42, %v503_v0 }
 0x26f   :  { %v144_v46 = vrot.slane %v136_v43, %v90_v15  ;;  %v156_v47 = vmul.f32 %v136_v43, %v505_v1  ;;  %v334_v15 = vpack.c.bf16 %v199_v12, %v198_v10 }
 0x270   :  { %v164_v48 = vsel %vm73_vm0, %v155_v45, 0.0 }
 0x271   :  { %v171_v49 = vsel %vm73_vm0, %v156_v47, 0.0  ;;  %v165_v50 = vrot.slane %v164_v48, 4  ;;  %v145_v51 = vsel %vm96_vm2, %v144_v46, %v140_v44  ;;  %v161_v63 = vpop.permute.xlu0 %160  ;;  %335 = vmatpush3.bf16.msra.mxu0 %v334_v15 }
 0x272   :  { %v172_v52 = vrot.slane %v171_v49, 4  ;;  %v147_v53 = vsel %vm99_vm3, %v145_v51, 0.0  ;;  %v163_v2 = vmul.f32 %v161_v63, %v157_v62  ;;  %336 = vmatprep.subr.bf16.mxu0 %v446_v14 }
 0x273   :  { %v166_v54 = vadd.f32 %v165_v50, %v164_v48  ;;  %148 = vadd.xlane.f32.xlu1 %v147_v53 }
 0x274   :  { %v173_v55 = vadd.f32 %v172_v52, %v171_v49 }
 0x275   :  { %v167_v56 = vrot.slane %v166_v54, 2  ;;  %338 = vmatpush3.bf16.msra.mxu0 %v337_v17 }
 0x276   :  { %v174_v57 = vrot.slane %v173_v55, 2 }
 0x277   :  { %v168_v58 = vadd.f32 %v167_v56, %v166_v54 }
 0x278   :  { %v175_v59 = vadd.f32 %v174_v57, %v173_v55 }
 0x279   :  { %v169_v60 = vrot.slane %v168_v58, 1 }
 0x27a   :  { %v176_v61 = vrot.slane %v175_v59, 1 }
 0x27b   :  { %v170_v0 = vadd.f32 %v169_v60, %v168_v58 }
 0x27c   :  { %v177_v1 = vadd.f32 %v176_v61, %v175_v59 }
 0x27e   :  { %v180_v3 = vsel %vm96_vm2, %v177_v1, %v170_v0 }
 0x27f   :  { %v182_v4 = vadd.f32 %v180_v3, %v163_v2 }
 0x281   :  { %184 = vst.msk [vmem:[#allocation4] sm:$0x3] %vm57_vm4, %v182_v4 }
 0x288   :  { %v189_v20 = vld [vmem:[#allocation4] sm:$0x3] }
 0x300   :  { %v149_v7 = vpop.xlane.xlu1 %148 }
 0x301   :  { %v150_v8 = vadd.f32 %v149_v7, %v128_v6 }
 0x303   :  { %152 = vst.msk [vmem:[#allocation3] sm:$0x3] %vm54_vm1, %v150_v8 }
 0x30a   :  { %v190_v9 = vld [vmem:[#allocation3] sm:$0x3] }
 0x30b   :  { %193 = vperm.xlu0 %350, %v190_v9  }
 0x38a   :  { %v194_v18 = vpop.permute.xlu0 %193 }
 0x38b   :  { %361 = vrcp.f32 %v194_v18 }
 0x395   :  { %v362_v19 = vpop.eup %361 }
 0x396   :  { %v197_v21 = vmul.f32 %v362_v19, %v189_v20 }
 0x398   :  { %331 = vmatmul.mubr.msk.f32.vlgmr.msra.gmra.mrb[0].mxu0 %vm73_vm0, %v197_v21 }
 0x46b   :  { %v278_v23 = vpop.f32.mrb[0].mxu0 }
 0x46c   :  { %v279_v25 = vadd.f32 %v315_v22, %v278_v23  ;;  %v332_v24 = vpop.f32.mrb[1].mxu0 }
 0x46e   :  { %v283_v26 = vsel %vm282_vm6, %v279_v25, -1e+30 }
 0x46f   :  { %v285_v27 = vsel %vm284_vm7, %v283_v26, -inf }
 0x470   :  { %286 = vmax.xlane.f32.xlu0 %v285_v27 }
 0x4fd   :  { %v287_v28 = vpop.xlane.xlu0 %286 }
 0x4fe   :  { %v288_v29 = vsub.f32 %v283_v26, %v287_v28 }
 0x500   :  { %v289_v30 = vmul.f32 1.442695, %v288_v29 }
 0x502   :  { %363 = vpow2.f32 %v289_v30 }
 0x50c   :  { %v364_v31 = vpop.eup %363 }
 0x50d   :  { %v291_v32 = vsel %vm284_vm7, %v364_v31, 0.0 }
 0x50e   :  { %292 = vadd.xlane.f32.xlu1 %v291_v32 }
 0x59b   :  { %v293_v33 = vpop.xlane.xlu1 %292 }
 0x59c   :  { %365 = vlog2.f32 %v293_v33 }
 0x5a6   :  { %v366_v34 = vpop.eup %365 }
 0x5a7   :  { %v295_v35 = vmul.f32 0.6931472, %v366_v34 }
 0x5a9   :  { %v296_v11 = vsub.f32 %v288_v29, %v295_v35 }
 0x5ab   :  { %297 = vst [vmem:[#allocation11] sm:$0x3] %v296_v11 }
 0x5ac   :  { %422 = shalt.err (!%p419_p6)
}
 0x5ad   :  { %s423_s25 = scalar_lea.hbm %s560_s5, 32 }
 0x5ae   :  { %p424_p7 = scmp.ne.s32.totalorder %s560_s5, %s423_s25  ;;  %p427_p8 = scmp.lt.u32.totalorder %s423_s25, %s560_s5 }
 0x5b0   :  { %p429_p9 = pnand %p427_p8, %p424_p7 }
 0x5b2   :  { %432 = shalt.err (!%p429_p9)
}
 0x5b3   :  { %307 = dma.vmem_to_hbm [thread:$0]  %s305_s21, 32, %s560_s5, [#allocation8]  }
 0x5b4   :  { %437 = dma.done.wait [#allocation8], 32  }
 0x5b5   :  { %438 = vsyncadd [#allocation8], 4294967264 }
 0x5b6   :  { %311 = vsyncpa [#allocation7], 1 }
 0x5b7   :  { %312 = vsyncpa [#allocation10], 1 }
 0x5b8   :  { %313 = vsyncpa [#allocation8], 1 }

</bundles_post_ra>
